<compile_context>
chip_gen: v5e
topology: v5e:2x2
jax: 0.10.0
libtpu: 0.0.40
codegen_flags: <defaults>
</compile_context>

<pallas_src>
import jax
import jax.numpy as jnp
from jax.experimental import pallas as pl
from jax.experimental.pallas import tpu as pltpu


# ----------------------------------------------------------------------------
# Kernel 1: fused QKV projection.
#   x2d (B*N, C) @ Wqkv (C, 3C) -> q, k, v each (B*N, C)
# ----------------------------------------------------------------------------
def qkv_proj_kernel(x_ref, w_ref, q_ref, k_ref, v_ref):
    C = x_ref.shape[1]
    # bf16 MXU operands, f32 accumulation.
    y = jnp.dot(
        x_ref[...].astype(jnp.bfloat16),
        w_ref[...],                       # already bf16 (pre-cast in wrapper)
        preferred_element_type=jnp.float32,
    )                                     # (TM, 3C)
    # TODO(synk): at large C, tile the 3C output dimension; at C a multiple of
    # 128 these lane slices land on vreg boundaries and are free.
    q_ref[...] = y[:, :C].astype(q_ref.dtype)
    k_ref[...] = y[:, C:2 * C].astype(k_ref.dtype)
    v_ref[...] = y[:, 2 * C:].astype(v_ref.dtype)


# ----------------------------------------------------------------------------
# Kernel 2: relu-pair attention with online softmax, fused output projection.
#   grid = (B * nq, nk); the key-tile axis (last) is the reduction axis.
# ----------------------------------------------------------------------------
def attn_kernel(q_ref, k_ref, v_ref, wp_ref, bp_ref, o_ref, m_sc, l_sc, acc_sc):
    ki = pl.program_id(1)

    @pl.when(ki == 0)
    def _init():
        m_sc[...] = jnp.full_like(m_sc[...], -jnp.inf)
        l_sc[...] = jnp.zeros_like(l_sc[...])
        acc_sc[...] = jnp.zeros_like(acc_sc[...])

    q = q_ref[...]            # (Tq, C) f32
    k_t = k_ref[...].T        # (C, Tk) f32 — single XLU transpose per key tile

    Tq, C = q.shape
    Tk = k_t.shape[1]

    # Channel-accumulated ReLU-pair score: only a lane-dense (Tq, Tk) f32 tile
    # is ever live (no (Tq, Tk, C) intermediate, no XLU lane-reduce over C).
    s = jnp.zeros((Tq, Tk), jnp.float32)
    for c in range(C):        # C is a compile-time constant; static unroll
        s = s + jnp.maximum(q[:, c:c + 1] + k_t[c:c + 1, :], 0.0)
    # TODO(synk): for very large C, switch to lax.fori_loop with chunked unroll
    # to bound trace size.

    # Online (flash-style) softmax accumulation across key tiles.
    m_prev = m_sc[...]                                        # (Tq, 1)
    m_new = jnp.maximum(m_prev, jnp.max(s, axis=-1, keepdims=True))
    alpha = jnp.exp(m_prev - m_new)                           # rescale old stats
    p = jnp.exp(s - m_new)                                    # (Tq, Tk)
    l_sc[...] = alpha * l_sc[...] + jnp.sum(p, axis=-1, keepdims=True)
    acc_sc[...] = alpha * acc_sc[...] + jnp.dot(
        p.astype(jnp.bfloat16),
        v_ref[...].astype(jnp.bfloat16),
        preferred_element_type=jnp.float32,
    )
    m_sc[...] = m_new

    @pl.when(ki == pl.num_programs(1) - 1)
    def _finalize():
        inv_l = pl.reciprocal(l_sc[...], approx=True)          # EUP vrcp
        out = (acc_sc[...] * inv_l).astype(jnp.bfloat16)       # (Tq, C)
        y = jnp.dot(out, wp_ref[...], preferred_element_type=jnp.float32)
        o_ref[...] = (y + bp_ref[...]).astype(o_ref.dtype)


# ----------------------------------------------------------------------------
# Wrapper
# ----------------------------------------------------------------------------
def attention_forward(x, wq_t, wk_t, wv_t, wp_t, bp, *, tq=None, tk=None):
    """x: (B, N, C); w*_t: (C, C) already transposed to (in, out); bp: (1, C)."""
    B, N, C = x.shape
    f32 = jnp.float32
    bf16 = jnp.bfloat16

    tq = min(N, 128) if tq is None else tq
    tk = min(N, 128) if tk is None else tk
    # TODO(synk): pad + mask the key axis for N not divisible by the tile sizes.
    assert N % tq == 0 and N % tk == 0, "demo requires tiles dividing N"
    assert (tq % 8 == 0 or tq == N) and (tk % 8 == 0 or tk == N)
    nq, nk = N // tq, N // tk

    M = B * N
    tm = min(M, 512)                       # large row tile amortizes grid overhead
    assert M % tm == 0

    vmem_cap = 24 * 1024 * 1024            # fits comfortably within v7x's 64 MiB

    # ---- Kernel 1: fused QKV projection, batch folded into M ----------------
    x2d = x.reshape(M, C)
    # Fused (C, 3C) weight, pre-cast to bf16 (halves weight DMA; f32 accumulate).
    wqkv = jnp.concatenate([wq_t, wk_t, wv_t], axis=1).astype(bf16)

    q2d, k2d, v2d = pl.pallas_call(
        qkv_proj_kernel,
        out_shape=(
            jax.ShapeDtypeStruct((M, C), f32),
            jax.ShapeDtypeStruct((M, C), f32),
            jax.ShapeDtypeStruct((M, C), f32),
        ),
        grid_spec=pltpu.PrefetchScalarGridSpec(
            num_scalar_prefetch=0,
            grid=(M // tm,),
            in_specs=[
                pl.BlockSpec((tm, C), lambda m: (m, 0)),       # x rows
                pl.BlockSpec((C, 3 * C), lambda m: (0, 0)),    # fused Wqkv (bf16)
            ],
            out_specs=[
                pl.BlockSpec((tm, C), lambda m: (m, 0)),       # q
                pl.BlockSpec((tm, C), lambda m: (m, 0)),       # k
                pl.BlockSpec((tm, C), lambda m: (m, 0)),       # v
            ],
        ),
        compiler_params=pltpu.CompilerParams(
            dimension_semantics=("parallel",),
            vmem_limit_bytes=vmem_cap,
        ),
    )(x2d, wqkv)

    # ---- Kernel 2: tiled relu-pair attention + fused projection -------------
    # Rows of the 2-D q/k/v are indexed directly (no split / reshape copies):
    # leading grid axis i = b * nq + qi, so the q/out block row index is i;
    # the k/v block row index is (i // nq) * nk + ki.
    out2d = pl.pallas_call(
        attn_kernel,
        out_shape=jax.ShapeDtypeStruct((M, C), x.dtype),
        grid_spec=pltpu.PrefetchScalarGridSpec(
            num_scalar_prefetch=0,
            grid=(B * nq, nk),
            in_specs=[
                pl.BlockSpec((tq, C), lambda i, ki: (i, 0)),                      # q tile
                pl.BlockSpec((tk, C), lambda i, ki: ((i // nq) * nk + ki, 0)),    # k tile
                pl.BlockSpec((tk, C), lambda i, ki: ((i // nq) * nk + ki, 0)),    # v tile
                pl.BlockSpec((C, C), lambda i, ki: (0, 0)),                       # Wp^T (bf16)
                pl.BlockSpec((1, C), lambda i, ki: (0, 0)),                       # proj bias
            ],
            out_specs=pl.BlockSpec((tq, C), lambda i, ki: (i, 0)),
            scratch_shapes=[
                pltpu.VMEM((tq, 1), f32),   # running max
                pltpu.VMEM((tq, 1), f32),   # running sum
                pltpu.VMEM((tq, C), f32),   # running attn @ v accumulator
            ],
        ),
        compiler_params=pltpu.CompilerParams(
            dimension_semantics=("parallel", "arbitrary"),
            vmem_limit_bytes=vmem_cap,
        ),
    )(q2d, k2d, v2d, wp_t.astype(bf16), bp.astype(f32))

    return out2d.reshape(B, N, C)


# ----------------------------------------------------------------------------
# Pure-JAX reference (mirrors the PyTorch forward exactly, all f32)
# ----------------------------------------------------------------------------
def reference_forward(x, wq_t, wk_t, wv_t, wp_t, bp):
    q = x @ wq_t
    k = x @ wk_t
    v = x @ wv_t
    score = jnp.sum(jax.nn.relu(q[:, :, None, :] + k[:, None, :, :]), axis=-1)
    attn = jax.nn.softmax(score, axis=-1)
    out = jnp.einsum("bij,bjc->bic", attn, v)
    return out @ wp_t + bp[0]


if __name__ == "__main__":
    # Small shapes consistent with the module: dim divisible by num_heads.
    B, N, C = 2, 16, 32    # batch, sequence length, embedding dim
    num_heads = 16         # unused by the forward pass (head_dim = 2)

    key = jax.random.PRNGKey(0)
    kx, kq, kk, kv, kp, kb = jax.random.split(key, 6)

    x = jax.random.normal(kx, (B, N, C), dtype=jnp.float32)

    # PyTorch Linear weights are (out, in); we store the transpose (in, out).
    scale = 1.0 / jnp.sqrt(jnp.float32(C))
    wq_t = jax.random.uniform(kq, (C, C), jnp.float32, -scale, scale)
    wk_t = jax.random.uniform(kk, (C, C), jnp.float32, -scale, scale)
    wv_t = jax.random.uniform(kv, (C, C), jnp.float32, -scale, scale)
    wp_t = jax.random.uniform(kp, (C, C), jnp.float32, -scale, scale)
    bp = jax.random.uniform(kb, (1, C), jnp.float32, -scale, scale)

    y_ref = reference_forward(x, wq_t, wk_t, wv_t, wp_t, bp)

    # Tolerance is set by the bf16 MXU operands (f32 accumulation) plus the
    # EUP approximate reciprocal on the softmax denominator — intentional for
    # inference throughput.
    ATOL = RTOL = 3e-2

    # Run 1: small tiles (Tq=Tk=8) so the online-softmax accumulation is
    # exercised across multiple key tiles and multiple query tiles.
    y_multi = attention_forward(x, wq_t, wk_t, wv_t, wp_t, bp, tq=8, tk=8)
    y_multi = jax.block_until_ready(y_multi)
    assert y_multi.shape == (B, N, C)
    assert jnp.allclose(y_multi, y_ref, atol=ATOL, rtol=RTOL), \
        "multi-tile kernel mismatch vs reference"

    # Run 2: default tiling (single key tile per sequence).
    y_def = attention_forward(x, wq_t, wk_t, wv_t, wp_t, bp)
    y_def = jax.block_until_ready(y_def)
    assert jnp.allclose(y_def, y_ref, atol=ATOL, rtol=RTOL), \
        "default-tile kernel mismatch vs reference"

    print("KERNEL_OK")
</pallas_src>

<mosaic_0001>
module attributes {stable_mosaic.version = 11 : i64} {
  func.func @qkv_proj_kernel(%arg0: i32, %arg1: memref<32x32xf32, #tpu.memory_space<vmem>>, %arg2: memref<32x96xbf16, #tpu.memory_space<vmem>>, %arg3: memref<32x32xf32, #tpu.memory_space<vmem>>, %arg4: memref<32x32xf32, #tpu.memory_space<vmem>>, %arg5: memref<32x32xf32, #tpu.memory_space<vmem>>) attributes {dimension_semantics = [#tpu.dimension_semantics<parallel>], iteration_bounds = array<i64: 1>, scalar_prefetch = 0 : i64, scratch_operands = 0 : i64, tpu.core_type = #tpu.core_type<tc>, window_params = [{transform_indices = @transform_0, window_bounds = array<i64: 32, 32>}, {pipeline_mode = #tpu.pipeline_mode<synchronous>, transform_indices = @transform_1, window_bounds = array<i64: 32, 96>}, {transform_indices = @transform_2, window_bounds = array<i64: 32, 32>}, {transform_indices = @transform_3, window_bounds = array<i64: 32, 32>}, {transform_indices = @transform_4, window_bounds = array<i64: 32, 32>}]} {
    %c0 = arith.constant 0 : index
    %c0_0 = arith.constant 0 : index
    %0 = vector.load %arg1[%c0, %c0_0] : memref<32x32xf32, #tpu.memory_space<vmem>>, vector<32x32xf32>
    %1 = arith.truncf %0 : vector<32x32xf32> to vector<32x32xbf16>
    %c0_1 = arith.constant 0 : index
    %c0_2 = arith.constant 0 : index
    %2 = vector.load %arg2[%c0_1, %c0_2] : memref<32x96xbf16, #tpu.memory_space<vmem>>, vector<32x96xbf16>
    %cst = arith.constant dense<0.000000e+00> : vector<32x96xf32>
    %3 = tpu.matmul %1, %2, %cst {dimension_numbers = #tpu.dot_dimension_numbers<[1], [0], [0], [1], [0, 0, 1, 1], [], []>} : vector<32x32xbf16>, vector<32x96xbf16>, vector<32x96xf32> -> vector<32x96xf32>
    %4 = vector.extract_strided_slice %3 {offsets = [0, 0], sizes = [32, 32], strides = [1, 1]} : vector<32x96xf32> to vector<32x32xf32>
    %c0_3 = arith.constant 0 : index
    %c0_4 = arith.constant 0 : index
    %5 = vector.load %arg3[%c0_3, %c0_4] : memref<32x32xf32, #tpu.memory_space<vmem>>, vector<32x32xf32>
    tpu.vector_store %arg3[%c0_3, %c0_4], %4 {strides = array<i32>} : memref<32x32xf32, #tpu.memory_space<vmem>>, vector<32x32xf32>,
    %6 = vector.extract_strided_slice %3 {offsets = [0, 32], sizes = [32, 32], strides = [1, 1]} : vector<32x96xf32> to vector<32x32xf32>
    %c0_5 = arith.constant 0 : index
    %c0_6 = arith.constant 0 : index
    %7 = vector.load %arg4[%c0_5, %c0_6] : memref<32x32xf32, #tpu.memory_space<vmem>>, vector<32x32xf32>
    tpu.vector_store %arg4[%c0_5, %c0_6], %6 {strides = array<i32>} : memref<32x32xf32, #tpu.memory_space<vmem>>, vector<32x32xf32>,
    %8 = vector.extract_strided_slice %3 {offsets = [0, 64], sizes = [32, 32], strides = [1, 1]} : vector<32x96xf32> to vector<32x32xf32>
    %c0_7 = arith.constant 0 : index
    %c0_8 = arith.constant 0 : index
    %9 = vector.load %arg5[%c0_7, %c0_8] : memref<32x32xf32, #tpu.memory_space<vmem>>, vector<32x32xf32>
    tpu.vector_store %arg5[%c0_7, %c0_8], %8 {strides = array<i32>} : memref<32x32xf32, #tpu.memory_space<vmem>>, vector<32x32xf32>,
    return
  }
  func.func @transform_0(%arg0: i32) -> (i32, i32) {
    %c0_i32 = arith.constant 0 : i32
    %c0_i32_0 = arith.constant 0 : i32
    return %arg0, %c0_i32 : i32, i32
  }
  func.func @transform_1(%arg0: i32) -> (i32, i32) {
    %c0_i32 = arith.constant 0 : i32
    %c0_i32_0 = arith.constant 0 : i32
    %c0_i32_1 = arith.constant 0 : i32
    return %c0_i32, %c0_i32_0 : i32, i32
  }
  func.func @transform_2(%arg0: i32) -> (i32, i32) {
    %c0_i32 = arith.constant 0 : i32
    %c0_i32_0 = arith.constant 0 : i32
    return %arg0, %c0_i32 : i32, i32
  }
  func.func @transform_3(%arg0: i32) -> (i32, i32) {
    %c0_i32 = arith.constant 0 : i32
    %c0_i32_0 = arith.constant 0 : i32
    return %arg0, %c0_i32 : i32, i32
  }
  func.func @transform_4(%arg0: i32) -> (i32, i32) {
    %c0_i32 = arith.constant 0 : i32
    %c0_i32_0 = arith.constant 0 : i32
    return %arg0, %c0_i32 : i32, i32
  }
}

</mosaic_0001>

<bundles_post_ra>
// kernel: tpu_custom_call.1
= control target key start
LH: loop header
LB: loop body
LE: loop exit
PB: predicated region body
PF: predicated region fallthrough
CT: control target
= control target key end

     0   :  { %10 = vsyncpa [#allocation3], 0  ;;  %s426_s0 = inlined_call_operand.hbm [shape: f32[32,32], index: 0, kind: input, shape index: {}]   ;;  %s427_s1 = inlined_call_operand.hbm [shape: bf16[32,96], index: 1, kind: input, shape index: {}]   ;;  %s428_s2 = inlined_call_operand.hbm [shape: f32[32,32], index: 2, kind: output, shape index: {0}]   ;;  %s429_s3 = inlined_call_operand.hbm [shape: f32[32,32], index: 3, kind: output, shape index: {1}]   ;;  %s430_s4 = inlined_call_operand.hbm [shape: f32[32,32], index: 4, kind: output, shape index: {2}]  }
   0x1   :  { %11 = vsyncpa [#allocation6], 0 }
   0x2   :  { %12 = vsyncpa [#allocation4], 0 }
   0x3   :  { %13 = vsyncpa [#allocation9], 0  ;;  %s18_s17 = sshll.u32 %s426_s0, 4  ;;  %s344_s18 = smov [#allocation2]   ;;  %s19_s17 = int_to_ptr.hbm [resolvable:$true] %s18_s17 }
   0x4   :  { %s20_s19 = sshll.u32 %s344_s18, 4  ;;  %s31_s22 = sshll.u32 %s427_s1, 4  ;;  %s21_s19 = int_to_ptr.vmem [resolvable:$true] %s20_s19  ;;  %s32_s22 = int_to_ptr.hbm [resolvable:$true] %s31_s22 }
   0x5   :  { %s345_s23 = smov 128   ;;  %s346_s24 = smov 8  }
   0x6   :  { %26 = dma.hbm_to_vmem [thread:$0]  %s19_s17, 512, %s21_s19, [#allocation3], %s345_s23, %s345_s23, %s346_s24  }
   0x7   :  { %s347_s25 = smov [#allocation5]   ;;  %s348_s27 = smov 64  }
   0x8   :  { %s33_s26 = sshll.u32 %s347_s25, 4  ;;  %s349_s0 = smov 4   ;;  %s34_s26 = int_to_ptr.vmem [resolvable:$true] %s33_s26 }
   0x9   :  { %39 = dma.hbm_to_vmem [thread:$0]  %s32_s22, 256, %s34_s26, [#allocation6], %s348_s27, %s348_s27, %s349_s0  }
   0xa   :  { %336 = dma.done.wait [#allocation3], 512  }
   0xb   :  { %337 = vsyncadd [#allocation3], 4294966784 }
   0xc   :  { %338 = dma.done.wait [#allocation6], 256  }
   0xd   :  { %339 = vsyncadd [#allocation6], 4294967040  ;;  %v203_v0 = vld [vmem:[#allocation5 + $0x8] sm:$0xff]  ;;  %v202_v1 = vld [vmem:[#allocation5] sm:$0xff]  ;;  %vm71_vm0 = vcmask 261120   ;;  %s350_s1 = smov 96  }
   0xe   :  { %v49_v2 = vld [vmem:[#allocation2] sm:$0xff]  ;;  %84 = vmatpush.bf16.msra.mxu0 %v203_v0  ;;  %204 = vmatpush.bf16.msra.mxu1 %v203_v0  ;;  %v50_v3 = vld [vmem:[#allocation2 + $0x8] sm:$0xff]  ;;  %v51_v4 = vld [vmem:[#allocation2 + $0x10] sm:$0xff]  ;;  %s143_s30 = sshll.u32 %s428_s2, 4  ;;  %s351_s5 = smov [#allocation7]   ;;  %s144_s30 = int_to_ptr.hbm [resolvable:$true] %s143_s30 }
   0xf   :  { %v52_v5 = vld [vmem:[#allocation2 + $0x18] sm:$0xff]  ;;  %v53_v6 = vpack.c.bf16 %v50_v3, %v49_v2  ;;  %s141_s6 = sshll.u32 %s351_s5, 4  ;;  %s352_s2 = smov [#allocation8]   ;;  %s142_s6 = int_to_ptr.vmem [resolvable:$true] %s141_s6 }
  0x10   :  { %v54_v7 = vpack.c.bf16 %v52_v5, %v51_v4  ;;  %s154_s7 = sshll.u32 %s352_s2, 4  ;;  %s156_s10 = sshll.u32 %s429_s3, 4  ;;  %s155_s7 = int_to_ptr.vmem [resolvable:$true] %s154_s7  ;;  %s157_s10 = int_to_ptr.hbm [resolvable:$true] %s156_s10 }
  0x11   :  { %s353_s11 = smov [#allocation10]   ;;  %s169_s15 = sshll.u32 %s430_s4, 4  ;;  %s170_s15 = int_to_ptr.hbm [resolvable:$true] %s169_s15 }
  0x12   :  { %85 = vmatpush.bf16.msra.mxu0 %v202_v1  ;;  %205 = vmatpush.bf16.msra.mxu1 %v202_v1  ;;  %s167_s12 = sshll.u32 %s353_s11, 4  ;;  %s168_s12 = int_to_ptr.vmem [resolvable:$true] %s167_s12 }
  0x15   :  { %200 = vmatmul.msk.bf16.vlgmr.msra.gmra.mxu0 %vm71_vm0, %v53_v6  ;;  %201 = vmatmul.msk.bf16.vlgmr.msra.gmra.mxu1 %vm71_vm0, %v54_v7 }
  0x92   :  { %v87_v8 = vpop.f32.mrf.mxu0  ;;  %v92_v9 = vpop.f32.mrf.mxu1 }
  0x93   :  { %97 = vst.msk [vmem:[#allocation7] sm:$0xff] %vm71_vm0, %v87_v8  ;;  %109 = vrot.lane.b32.xlu1 %v92_v9, %s350_s1  ;;  %121 = vrot.lane.b32.xlu2 %v87_v8, %s348_s27 }
  0x94   :  { %99 = vst.msk [vmem:[#allocation7 + $0x10] sm:$0xff] %vm71_vm0, %v92_v9  ;;  %105 = vrot.lane.b32.xlu0 %v87_v8, %s350_s1 }
  0x9a   :  { %v89_v10 = vpop.f32.mrf.mxu0  ;;  %v94_v11 = vpop.f32.mrf.mxu1 }
  0x9b   :  { %98 = vst.msk [vmem:[#allocation7 + $0x8] sm:$0xff] %vm71_vm0, %v89_v10  ;;  %111 = vrot.lane.b32.xlu1 %v94_v11, %s350_s1  ;;  %123 = vrot.lane.b32.xlu2 %v89_v10, %s348_s27 }
  0x9c   :  { %100 = vst.msk [vmem:[#allocation7 + $0x18] sm:$0xff] %vm71_vm0, %v94_v11  ;;  %107 = vrot.lane.b32.xlu0 %v89_v10, %s350_s1 }
  0x9d   :  { %149 = dma.vmem_to_hbm [thread:$0]  %s142_s6, 512, %s144_s30, [#allocation4], %s345_s23, %s345_s23, %s346_s24  }
  0xa3   :  { %127 = vrot.lane.b32.xlu1 %v94_v11, %s348_s27 }
  0xa4   :  { %125 = vrot.lane.b32.xlu0 %v92_v9, %s348_s27 }
  0xed   :  { %v122_v12 = vpop.permute.xlu2 %121 }
  0xee   :  { %133 = vst.msk [vmem:[#allocation10] sm:$0xff] %vm71_vm0, %v122_v12 }
  0xf5   :  { %v124_v13 = vpop.permute.xlu2 %123 }
  0xf6   :  { %134 = vst.msk [vmem:[#allocation10 + $0x8] sm:$0xff] %vm71_vm0, %v124_v13 }
 0x105   :  { %v110_v14 = vpop.permute.xlu1 %109 }
 0x106   :  { %119 = vst.msk [vmem:[#allocation8 + $0x10] sm:$0xff] %vm71_vm0, %v110_v14  ;;  %v106_v15 = vpop.permute.xlu0 %105 }
 0x107   :  { %117 = vst.msk [vmem:[#allocation8] sm:$0xff] %vm71_vm0, %v106_v15 }
 0x10d   :  { %v112_v16 = vpop.permute.xlu1 %111 }
 0x10e   :  { %120 = vst.msk [vmem:[#allocation8 + $0x18] sm:$0xff] %vm71_vm0, %v112_v16  ;;  %v108_v17 = vpop.permute.xlu0 %107 }
 0x10f   :  { %118 = vst.msk [vmem:[#allocation8 + $0x8] sm:$0xff] %vm71_vm0, %v108_v17 }
 0x110   :  { %162 = dma.vmem_to_hbm [thread:$0]  %s155_s7, 512, %s157_s10, [#allocation9], %s345_s23, %s345_s23, %s346_s24  }
 0x115   :  { %v128_v18 = vpop.permute.xlu1 %127 }
 0x116   :  { %136 = vst.msk [vmem:[#allocation10 + $0x18] sm:$0xff] %vm71_vm0, %v128_v18  ;;  %v126_v19 = vpop.permute.xlu0 %125 }
 0x117   :  { %135 = vst.msk [vmem:[#allocation10 + $0x10] sm:$0xff] %vm71_vm0, %v126_v19 }
 0x118   :  { %175 = dma.vmem_to_hbm [thread:$0]  %s168_s12, 512, %s170_s15, [#allocation9], %s345_s23, %s345_s23, %s346_s24  }
 0x119   :  { %340 = dma.done.wait [#allocation4], 512  }
 0x11a   :  { %341 = vsyncadd [#allocation4], 4294966784 }
 0x11b   :  { %342 = dma.done.wait [#allocation9], 1024  }
 0x11c   :  { %343 = vsyncadd [#allocation9], 4294966272 }
 0x11d   :  { %188 = vsyncpa [#allocation3], 1 }
 0x11e   :  { %189 = vsyncpa [#allocation6], 1 }
 0x11f   :  { %190 = vsyncpa [#allocation4], 1 }
 0x120   :  { %191 = vsyncpa [#allocation9], 1 }

</bundles_post_ra>
